<compile_context>
chip_gen: v7x
topology: tpu7x:2x2x1
jax: 0.10.0
libtpu: 0.0.40
codegen_flags: <defaults>
</compile_context>

<pallas_src>
import jax
import jax.numpy as jnp
from jax.experimental import pallas as pl
from jax.experimental.pallas import tpu as pltpu

HIDDEN = 256


def _round_up(n, m):
    return ((n + m - 1) // m) * m


def dueling_mlp_kernel(x_ref,
                       w1_ref, b1_ref, w2_ref, b2_ref,
                       w3_ref, b3_ref, w4_ref, b4_ref,
                       wq_ref, bq_ref,
                       out_ref):
    """fc1..fc4 with ReLU, then the folded dueling head (emits Q directly)."""
    f32 = jnp.float32
    bf16 = jnp.bfloat16

    def layer(h, w_ref, b_ref):
        # bf16 MXU operands, f32 accumulate + bias + ReLU, bf16 activation out.
        y = jnp.dot(h, w_ref[...], preferred_element_type=f32) + b_ref[...]
        return jnp.maximum(y, 0.0).astype(bf16)

    h = layer(x_ref[...], w1_ref, b1_ref)
    h = layer(h, w2_ref, b2_ref)
    h = layer(h, w3_ref, b3_ref)
    h = layer(h, w4_ref, b4_ref)

    # Head weights already encode Q = V + A - mean(A); padded lanes are zero.
    out_ref[...] = jnp.dot(h, wq_ref[...],
                           preferred_element_type=f32) + bq_ref[...]


def dueling_ddqn_forward(x, params):
    """x: [B, D_in] f32; params: dict of f32 weights/biases. Returns [B, output_dim]."""
    B, d_in = x.shape
    out_dim = params["wa"].shape[1]
    f32 = jnp.float32
    bf16 = jnp.bfloat16

    # --- Fold dueling combine into the head weights (combine in f32, cast bf16).
    w_q = params["wa"] + params["wv"] - jnp.mean(params["wa"], axis=1,
                                                 keepdims=True)
    b_q = params["ba"] + params["bv"] - jnp.mean(params["ba"], axis=1,
                                                 keepdims=True)
    n_head = _round_up(out_dim, 128)          # lane-dense head width
    w_head = jnp.zeros((HIDDEN, n_head), f32).at[:, :out_dim].set(w_q)
    b_head = jnp.zeros((1, n_head), f32).at[:, :out_dim].set(b_q)

    # --- Lane-align fc1's K dimension (zero rows contribute nothing).
    d_pad = _round_up(d_in, 128)
    w1 = params["w1"]
    if d_pad != d_in:
        w1 = jnp.pad(w1, ((0, d_pad - d_in), (0, 0)))

    weights = (
        w1.astype(bf16), params["b1"],
        params["w2"].astype(bf16), params["b2"],
        params["w3"].astype(bf16), params["b3"],
        params["w4"].astype(bf16), params["b4"],
        w_head.astype(bf16), b_head,
    )

    # --- Batch tiling: big tiles to amortize grid overhead; 256-multiples fill
    #     the v6e/v7x MXU M dimension; even step count keeps both v7x TCs busy.
    b_pad = _round_up(B, 8)
    MAX_TB = 512
    if b_pad <= MAX_TB:
        tb = b_pad                                   # single step, no padding waste
    else:
        tb = 256 if b_pad <= 2048 else MAX_TB
        b_pad = _round_up(b_pad, tb)
        if (b_pad // tb) % 2 == 1:
            b_pad += tb                              # force even grid for v7x

    # x padded (batch + K) and cast to bf16 at the call boundary.
    x_p = jnp.zeros((b_pad, d_pad), bf16).at[:B, :d_in].set(x.astype(bf16))

    x_spec = pl.BlockSpec((tb, d_pad), lambda i: (i, 0))
    # Constant index maps: each weight block is DMA'd once and stays VMEM-resident.
    w_specs = [pl.BlockSpec(w.shape, lambda i: (0, 0)) for w in weights]
    out_spec = pl.BlockSpec((tb, n_head), lambda i: (i, 0))

    q_pad = pl.pallas_call(
        dueling_mlp_kernel,
        out_shape=jax.ShapeDtypeStruct((b_pad, n_head), jnp.float32),
        grid=(b_pad // tb,),
        in_specs=[x_spec] + w_specs,
        out_specs=out_spec,
        compiler_params=pltpu.CompilerParams(
            dimension_semantics=("parallel",)),
    )(x_p, *weights)

    return q_pad[:B, :out_dim]


def init_params(key, input_dim, output_dim):
    """Deterministic PyTorch-style uniform(-1/sqrt(fan_in), 1/sqrt(fan_in)) init."""
    def linear(key, fan_in, fan_out):
        kw, kb = jax.random.split(key)
        bound = 1.0 / jnp.sqrt(jnp.float32(fan_in))
        w = jax.random.uniform(kw, (fan_in, fan_out), jnp.float32, -bound, bound)
        b = jax.random.uniform(kb, (1, fan_out), jnp.float32, -bound, bound)
        return w, b

    keys = jax.random.split(key, 6)
    p = {}
    p["w1"], p["b1"] = linear(keys[0], input_dim, HIDDEN)
    p["w2"], p["b2"] = linear(keys[1], HIDDEN, HIDDEN)
    p["w3"], p["b3"] = linear(keys[2], HIDDEN, HIDDEN)
    p["w4"], p["b4"] = linear(keys[3], HIDDEN, HIDDEN)
    p["wa"], p["ba"] = linear(keys[4], HIDDEN, output_dim)
    p["wv"], p["bv"] = linear(keys[5], HIDDEN, 1)
    return p


if __name__ == "__main__":
    # TODO(synk): optimizer / MSE loss / device handling from the PyTorch module
    # are training utilities, not part of the forward pass, and are not ported.
    B = 8            # batch of states
    INPUT_DIM = 32   # state feature dim (input_dim = (32,))
    OUTPUT_DIM = 8   # number of actions

    key = jax.random.PRNGKey(0)
    k_params, k_x = jax.random.split(key)
    params = init_params(k_params, INPUT_DIM, OUTPUT_DIM)
    x = jax.random.normal(k_x, (B, INPUT_DIM), jnp.float32)

    q = dueling_ddqn_forward(x, params)
    q = jax.block_until_ready(q)

    # Reference with the same bf16-weight / f32-accumulate numerics.
    def ref(x, p):
        bf16 = jnp.bfloat16
        f32 = jnp.float32

        def lin(h, w, b):
            return jnp.dot(h.astype(bf16), w.astype(bf16),
                           preferred_element_type=f32) + b

        h = jax.nn.relu(lin(x, p["w1"], p["b1"]))
        h = jax.nn.relu(lin(h, p["w2"], p["b2"]))
        h = jax.nn.relu(lin(h, p["w3"], p["b3"]))
        h = jax.nn.relu(lin(h, p["w4"], p["b4"]))
        V = lin(h, p["wv"], p["bv"])
        A = lin(h, p["wa"], p["ba"])
        return V + A - jnp.mean(A, axis=1, keepdims=True)

    expected = ref(x, params)
    assert q.shape == (B, OUTPUT_DIM)
    assert jnp.allclose(q, expected, atol=2e-2, rtol=2e-2), (
        float(jnp.max(jnp.abs(q - expected))))

    print("KERNEL_OK")
</pallas_src>

<mosaic_0001>
module attributes {stable_mosaic.version = 11 : i64} {
  func.func @dueling_mlp_kernel(%arg0: i32, %arg1: memref<8x128xbf16, #tpu.memory_space<vmem>>, %arg2: memref<128x256xbf16, #tpu.memory_space<vmem>>, %arg3: memref<1x256xf32, #tpu.memory_space<vmem>>, %arg4: memref<256x256xbf16, #tpu.memory_space<vmem>>, %arg5: memref<1x256xf32, #tpu.memory_space<vmem>>, %arg6: memref<256x256xbf16, #tpu.memory_space<vmem>>, %arg7: memref<1x256xf32, #tpu.memory_space<vmem>>, %arg8: memref<256x256xbf16, #tpu.memory_space<vmem>>, %arg9: memref<1x256xf32, #tpu.memory_space<vmem>>, %arg10: memref<256x128xbf16, #tpu.memory_space<vmem>>, %arg11: memref<1x128xf32, #tpu.memory_space<vmem>>, %arg12: memref<8x128xf32, #tpu.memory_space<vmem>>) attributes {dimension_semantics = [#tpu.dimension_semantics<parallel>], iteration_bounds = array<i64: 1>, scalar_prefetch = 0 : i64, scratch_operands = 0 : i64, tpu.core_type = #tpu.core_type<tc>, window_params = [{transform_indices = @transform_0, window_bounds = array<i64: 8, 128>}, {pipeline_mode = #tpu.pipeline_mode<synchronous>, transform_indices = @transform_1, window_bounds = array<i64: 128, 256>}, {pipeline_mode = #tpu.pipeline_mode<synchronous>, transform_indices = @transform_2, window_bounds = array<i64: 1, 256>}, {pipeline_mode = #tpu.pipeline_mode<synchronous>, transform_indices = @transform_3, window_bounds = array<i64: 256, 256>}, {pipeline_mode = #tpu.pipeline_mode<synchronous>, transform_indices = @transform_4, window_bounds = array<i64: 1, 256>}, {pipeline_mode = #tpu.pipeline_mode<synchronous>, transform_indices = @transform_5, window_bounds = array<i64: 256, 256>}, {pipeline_mode = #tpu.pipeline_mode<synchronous>, transform_indices = @transform_6, window_bounds = array<i64: 1, 256>}, {pipeline_mode = #tpu.pipeline_mode<synchronous>, transform_indices = @transform_7, window_bounds = array<i64: 256, 256>}, {pipeline_mode = #tpu.pipeline_mode<synchronous>, transform_indices = @transform_8, window_bounds = array<i64: 1, 256>}, {pipeline_mode = #tpu.pipeline_mode<synchronous>, transform_indices = @transform_9, window_bounds = array<i64: 256, 128>}, {pipeline_mode = #tpu.pipeline_mode<synchronous>, transform_indices = @transform_10, window_bounds = array<i64: 1, 128>}, {transform_indices = @transform_11, window_bounds = array<i64: 8, 128>}]} {
    %c0 = arith.constant 0 : index
    %c0_0 = arith.constant 0 : index
    %0 = vector.load %arg1[%c0, %c0_0] : memref<8x128xbf16, #tpu.memory_space<vmem>>, vector<8x128xbf16>
    %c0_1 = arith.constant 0 : index
    %c0_2 = arith.constant 0 : index
    %1 = vector.load %arg2[%c0_1, %c0_2] : memref<128x256xbf16, #tpu.memory_space<vmem>>, vector<128x256xbf16>
    %cst = arith.constant dense<0.000000e+00> : vector<8x256xf32>
    %2 = tpu.matmul %0, %1, %cst {dimension_numbers = #tpu.dot_dimension_numbers<[1], [0], [0], [1], [0, 0, 1, 1], [], []>} : vector<8x128xbf16>, vector<128x256xbf16>, vector<8x256xf32> -> vector<8x256xf32>
    %c0_3 = arith.constant 0 : index
    %c0_4 = arith.constant 0 : index
    %3 = vector.load %arg3[%c0_3, %c0_4] : memref<1x256xf32, #tpu.memory_space<vmem>>, vector<1x256xf32>
    %4 = vector.broadcast %3 : vector<1x256xf32> to vector<8x256xf32>
    %5 = arith.addf %2, %4 : vector<8x256xf32>
    %cst_5 = arith.constant 0.000000e+00 : f32
    %6 = vector.broadcast %cst_5 : f32 to vector<8x256xf32>
    %7 = arith.maximumf %5, %6 : vector<8x256xf32>
    %8 = arith.truncf %7 : vector<8x256xf32> to vector<8x256xbf16>
    %c0_6 = arith.constant 0 : index
    %c0_7 = arith.constant 0 : index
    %9 = vector.load %arg4[%c0_6, %c0_7] : memref<256x256xbf16, #tpu.memory_space<vmem>>, vector<256x256xbf16>
    %cst_8 = arith.constant dense<0.000000e+00> : vector<8x256xf32>
    %10 = tpu.matmul %8, %9, %cst_8 {dimension_numbers = #tpu.dot_dimension_numbers<[1], [0], [0], [1], [0, 0, 1, 1], [], []>} : vector<8x256xbf16>, vector<256x256xbf16>, vector<8x256xf32> -> vector<8x256xf32>
    %c0_9 = arith.constant 0 : index
    %c0_10 = arith.constant 0 : index
    %11 = vector.load %arg5[%c0_9, %c0_10] : memref<1x256xf32, #tpu.memory_space<vmem>>, vector<1x256xf32>
    %12 = vector.broadcast %11 : vector<1x256xf32> to vector<8x256xf32>
    %13 = arith.addf %10, %12 : vector<8x256xf32>
    %cst_11 = arith.constant 0.000000e+00 : f32
    %14 = vector.broadcast %cst_11 : f32 to vector<8x256xf32>
    %15 = arith.maximumf %13, %14 : vector<8x256xf32>
    %16 = arith.truncf %15 : vector<8x256xf32> to vector<8x256xbf16>
    %c0_12 = arith.constant 0 : index
    %c0_13 = arith.constant 0 : index
    %17 = vector.load %arg6[%c0_12, %c0_13] : memref<256x256xbf16, #tpu.memory_space<vmem>>, vector<256x256xbf16>
    %cst_14 = arith.constant dense<0.000000e+00> : vector<8x256xf32>
    %18 = tpu.matmul %16, %17, %cst_14 {dimension_numbers = #tpu.dot_dimension_numbers<[1], [0], [0], [1], [0, 0, 1, 1], [], []>} : vector<8x256xbf16>, vector<256x256xbf16>, vector<8x256xf32> -> vector<8x256xf32>
    %c0_15 = arith.constant 0 : index
    %c0_16 = arith.constant 0 : index
    %19 = vector.load %arg7[%c0_15, %c0_16] : memref<1x256xf32, #tpu.memory_space<vmem>>, vector<1x256xf32>
    %20 = vector.broadcast %19 : vector<1x256xf32> to vector<8x256xf32>
    %21 = arith.addf %18, %20 : vector<8x256xf32>
    %cst_17 = arith.constant 0.000000e+00 : f32
    %22 = vector.broadcast %cst_17 : f32 to vector<8x256xf32>
    %23 = arith.maximumf %21, %22 : vector<8x256xf32>
    %24 = arith.truncf %23 : vector<8x256xf32> to vector<8x256xbf16>
    %c0_18 = arith.constant 0 : index
    %c0_19 = arith.constant 0 : index
    %25 = vector.load %arg8[%c0_18, %c0_19] : memref<256x256xbf16, #tpu.memory_space<vmem>>, vector<256x256xbf16>
    %cst_20 = arith.constant dense<0.000000e+00> : vector<8x256xf32>
    %26 = tpu.matmul %24, %25, %cst_20 {dimension_numbers = #tpu.dot_dimension_numbers<[1], [0], [0], [1], [0, 0, 1, 1], [], []>} : vector<8x256xbf16>, vector<256x256xbf16>, vector<8x256xf32> -> vector<8x256xf32>
    %c0_21 = arith.constant 0 : index
    %c0_22 = arith.constant 0 : index
    %27 = vector.load %arg9[%c0_21, %c0_22] : memref<1x256xf32, #tpu.memory_space<vmem>>, vector<1x256xf32>
    %28 = vector.broadcast %27 : vector<1x256xf32> to vector<8x256xf32>
    %29 = arith.addf %26, %28 : vector<8x256xf32>
    %cst_23 = arith.constant 0.000000e+00 : f32
    %30 = vector.broadcast %cst_23 : f32 to vector<8x256xf32>
    %31 = arith.maximumf %29, %30 : vector<8x256xf32>
    %32 = arith.truncf %31 : vector<8x256xf32> to vector<8x256xbf16>
    %c0_24 = arith.constant 0 : index
    %c0_25 = arith.constant 0 : index
    %33 = vector.load %arg10[%c0_24, %c0_25] : memref<256x128xbf16, #tpu.memory_space<vmem>>, vector<256x128xbf16>
    %cst_26 = arith.constant dense<0.000000e+00> : vector<8x128xf32>
    %34 = tpu.matmul %32, %33, %cst_26 {dimension_numbers = #tpu.dot_dimension_numbers<[1], [0], [0], [1], [0, 0, 1, 1], [], []>} : vector<8x256xbf16>, vector<256x128xbf16>, vector<8x128xf32> -> vector<8x128xf32>
    %c0_27 = arith.constant 0 : index
    %c0_28 = arith.constant 0 : index
    %35 = vector.load %arg11[%c0_27, %c0_28] : memref<1x128xf32, #tpu.memory_space<vmem>>, vector<1x128xf32>
    %36 = vector.broadcast %35 : vector<1x128xf32> to vector<8x128xf32>
    %37 = arith.addf %34, %36 : vector<8x128xf32>
    %c0_29 = arith.constant 0 : index
    %c0_30 = arith.constant 0 : index
    %38 = vector.load %arg12[%c0_29, %c0_30] : memref<8x128xf32, #tpu.memory_space<vmem>>, vector<8x128xf32>
    tpu.vector_store %arg12[%c0_29, %c0_30], %37 {strides = array<i32>} : memref<8x128xf32, #tpu.memory_space<vmem>>, vector<8x128xf32>,
    return
  }
  func.func @transform_0(%arg0: i32) -> (i32, i32) {
    %c0_i32 = arith.constant 0 : i32
    %c0_i32_0 = arith.constant 0 : i32
    return %arg0, %c0_i32 : i32, i32
  }
  func.func @transform_1(%arg0: i32) -> (i32, i32) {
    %c0_i32 = arith.constant 0 : i32
    %c0_i32_0 = arith.constant 0 : i32
    %c0_i32_1 = arith.constant 0 : i32
    return %c0_i32, %c0_i32_0 : i32, i32
  }
  func.func @transform_2(%arg0: i32) -> (i32, i32) {
    %c0_i32 = arith.constant 0 : i32
    %c0_i32_0 = arith.constant 0 : i32
    %c0_i32_1 = arith.constant 0 : i32
    return %c0_i32, %c0_i32_0 : i32, i32
  }
  func.func @transform_3(%arg0: i32) -> (i32, i32) {
    %c0_i32 = arith.constant 0 : i32
    %c0_i32_0 = arith.constant 0 : i32
    %c0_i32_1 = arith.constant 0 : i32
    return %c0_i32, %c0_i32_0 : i32, i32
  }
  func.func @transform_4(%arg0: i32) -> (i32, i32) {
    %c0_i32 = arith.constant 0 : i32
    %c0_i32_0 = arith.constant 0 : i32
    %c0_i32_1 = arith.constant 0 : i32
    return %c0_i32, %c0_i32_0 : i32, i32
  }
  func.func @transform_5(%arg0: i32) -> (i32, i32) {
    %c0_i32 = arith.constant 0 : i32
    %c0_i32_0 = arith.constant 0 : i32
    %c0_i32_1 = arith.constant 0 : i32
    return %c0_i32, %c0_i32_0 : i32, i32
  }
  func.func @transform_6(%arg0: i32) -> (i32, i32) {
    %c0_i32 = arith.constant 0 : i32
    %c0_i32_0 = arith.constant 0 : i32
    %c0_i32_1 = arith.constant 0 : i32
    return %c0_i32, %c0_i32_0 : i32, i32
  }
  func.func @transform_7(%arg0: i32) -> (i32, i32) {
    %c0_i32 = arith.constant 0 : i32
    %c0_i32_0 = arith.constant 0 : i32
    %c0_i32_1 = arith.constant 0 : i32
    return %c0_i32, %c0_i32_0 : i32, i32
  }
  func.func @transform_8(%arg0: i32) -> (i32, i32) {
    %c0_i32 = arith.constant 0 : i32
    %c0_i32_0 = arith.constant 0 : i32
    %c0_i32_1 = arith.constant 0 : i32
    return %c0_i32, %c0_i32_0 : i32, i32
  }
  func.func @transform_9(%arg0: i32) -> (i32, i32) {
    %c0_i32 = arith.constant 0 : i32
    %c0_i32_0 = arith.constant 0 : i32
    %c0_i32_1 = arith.constant 0 : i32
    return %c0_i32, %c0_i32_0 : i32, i32
  }
  func.func @transform_10(%arg0: i32) -> (i32, i32) {
    %c0_i32 = arith.constant 0 : i32
    %c0_i32_0 = arith.constant 0 : i32
    %c0_i32_1 = arith.constant 0 : i32
    return %c0_i32, %c0_i32_0 : i32, i32
  }
  func.func @transform_11(%arg0: i32) -> (i32, i32) {
    %c0_i32 = arith.constant 0 : i32
    %c0_i32_0 = arith.constant 0 : i32
    return %arg0, %c0_i32 : i32, i32
  }
}

</mosaic_0001>

<bundles_post_ra>
// kernel: tpu_custom_call.1
= control target key start
LH: loop header
LB: loop body
LE: loop exit
PB: predicated region body
PF: predicated region fallthrough
CT: control target
= control target key end

     0   :  { %16 = vsyncpa [#allocation3], 0  ;;  %s1921_s0 = inlined_call_operand.hbm [shape: bf16[8,128], index: 0, kind: input, shape index: {}]   ;;  %s1922_s1 = inlined_call_operand.hbm [shape: bf16[128,256], index: 1, kind: input, shape index: {}]   ;;  %s1923_s2 = inlined_call_operand.vmem [shape: f32[1,256], index: 2, kind: input, shape index: {}]   ;;  %s1924_s3 = inlined_call_operand.hbm [shape: bf16[256,256], index: 3, kind: input, shape index: {}]   ;;  %s1925_s4 = inlined_call_operand.vmem [shape: f32[1,256], index: 4, kind: input, shape index: {}]   ;;  %s1926_s5 = inlined_call_operand.hbm [shape: bf16[256,256], index: 5, kind: input, shape index: {}]   ;;  %s1927_s6 = inlined_call_operand.vmem [shape: f32[1,256], index: 6, kind: input, shape index: {}]   ;;  %s1928_s7 = inlined_call_operand.hbm [shape: bf16[256,256], index: 7, kind: input, shape index: {}]   ;;  %s1929_s8 = inlined_call_operand.vmem [shape: f32[1,256], index: 8, kind: input, shape index: {}]   ;;  %s1930_s9 = inlined_call_operand.hbm [shape: bf16[256,128], index: 9, kind: input, shape index: {}]   ;;  %s1931_s10 = inlined_call_operand.vmem [shape: f32[1,128], index: 10, kind: input, shape index: {}]   ;;  %s1932_s11 = inlined_call_operand.hbm [shape: f32[8,128], index: 11, kind: output, shape index: {}]  }
   0x1   :  { %17 = vsyncpa [#allocation6], 0 }
   0x2   :  { %18 = vsyncpa [#allocation9], 0 }
   0x3   :  { %19 = vsyncpa [#allocation12], 0 }
   0x4   :  { %20 = vsyncpa [#allocation4], 0  ;;  %s1726_s17 = smov [#allocation5]   ;;  %s1562_s21 = scalar_lea.hbm %s1922_s1, 2048 }
   0x5   :  { %s36_s18 = sshll.u32 %s1726_s17, 4  ;;  %p1563_p0 = scmp.ne.s32.totalorder %s1922_s1, %s1562_s21  ;;  %s37_s18 = int_to_ptr.vmem [resolvable:$true] %s36_s18 }
   0x6   :  { %p1566_p1 = scmp.lt.u32.totalorder %s1562_s21, %s1922_s1 }
   0x8   :  { %p1568_p2 = pnand %p1566_p1, %p1563_p0 }
   0xa   :  { %1571 = shalt.err (!%p1568_p2)
}
   0xb   :  { %s1572_s26 = scalar_lea.vmem %s37_s18, 2048  ;;  %p1577_p4 = scmp.lt.s32.totalorder %s37_s18, %s37_s18 }
   0xc   :  { %p1573_p3 = scmp.ne.s32.totalorder %s37_s18, %s1572_s26  ;;  %p1578_p5 = scmp.lt.s32.totalorder %s1572_s26, %s1572_s26 }
   0xe   :  { %p1579_p6 = por %p1578_p5, %p1577_p4 }
  0x10   :  { %p1580_p7 = pnand %p1579_p6, %p1573_p3 }
  0x12   :  { %1583 = shalt.err (!%p1580_p7)
}
  0x13   :  { %s1727_s27 = smov 128   ;;  %s1728_s28 = smov 8  }
  0x14   :  { %42 = dma.hbm_to_vmem [thread:$0]  %s1922_s1, 2048, %s37_s18, [#allocation6], %s1727_s27, %s1727_s27, %s1728_s28  }
  0x15   :  { %s1729_s12 = smov [#allocation8]   ;;  %s1730_s14 = smov [#allocation2]  }
  0x16   :  { %s64_s13 = sshll.u32 %s1729_s12, 4  ;;  %s27_s15 = sshll.u32 %s1730_s14, 4  ;;  %s65_s13 = int_to_ptr.vmem [resolvable:$true] %s64_s13  ;;  %s28_s15 = int_to_ptr.vmem [resolvable:$true] %s27_s15 }
  0x17   :  { %s1584_s19 = scalar_lea.hbm %s1926_s5, 4096 }
  0x18   :  { %p1585_p8 = scmp.ne.s32.totalorder %s1926_s5, %s1584_s19  ;;  %p1588_p9 = scmp.lt.u32.totalorder %s1584_s19, %s1926_s5 }
  0x1a   :  { %p1590_p10 = pnand %p1588_p9, %p1585_p8 }
  0x1c   :  { %1593 = shalt.err (!%p1590_p10)
}
  0x1d   :  { %s1594_s1 = scalar_lea.vmem %s65_s13, 4096  ;;  %p1599_p12 = scmp.lt.s32.totalorder %s65_s13, %s65_s13 }
  0x1e   :  { %p1595_p11 = scmp.ne.s32.totalorder %s65_s13, %s1594_s1  ;;  %p1600_p13 = scmp.lt.s32.totalorder %s1594_s1, %s1594_s1 }
  0x20   :  { %p1601_p0 = por %p1600_p13, %p1599_p12 }
  0x22   :  { %p1602_p1 = pnand %p1601_p0, %p1595_p11 }
  0x24   :  { %1605 = shalt.err (!%p1602_p1)
}
  0x25   :  { %70 = dma.hbm_to_vmem [thread:$0]  %s1926_s5, 4096, %s65_s13, [#allocation9], %s1727_s27, %s1727_s27, %s1728_s28  }
  0x26   :  { %s1606_s29 = scalar_lea.hbm %s1921_s0, 64 }
  0x27   :  { %p1607_p2 = scmp.ne.s32.totalorder %s1921_s0, %s1606_s29  ;;  %p1610_p3 = scmp.lt.u32.totalorder %s1606_s29, %s1921_s0 }
  0x29   :  { %p1612_p4 = pnand %p1610_p3, %p1607_p2 }
  0x2b   :  { %1615 = shalt.err (!%p1612_p4)
}
  0x2c   :  { %s1616_s17 = scalar_lea.vmem %s28_s15, 64  ;;  %p1621_p6 = scmp.lt.s32.totalorder %s28_s15, %s28_s15 }
  0x2d   :  { %p1617_p5 = scmp.ne.s32.totalorder %s28_s15, %s1616_s17  ;;  %p1622_p7 = scmp.lt.s32.totalorder %s1616_s17, %s1616_s17 }
  0x2f   :  { %p1623_p8 = por %p1622_p7, %p1621_p6 }
  0x31   :  { %p1624_p9 = pnand %p1623_p8, %p1617_p5 }
  0x33   :  { %1627 = shalt.err (!%p1624_p9)
}
  0x34   :  { %30 = dma.hbm_to_vmem [thread:$0]  %s1921_s0, 64, %s28_s15, [#allocation3]  }
  0x35   :  { %s1731_s19 = smov [#allocation7]   ;;  %s1732_s21 = smov [#allocation10]  }
  0x36   :  { %s50_s20 = sshll.u32 %s1731_s19, 4  ;;  %s78_s22 = sshll.u32 %s1732_s21, 4  ;;  %s51_s20 = int_to_ptr.vmem [resolvable:$true] %s50_s20  ;;  %s79_s22 = int_to_ptr.vmem [resolvable:$true] %s78_s22 }
  0x37   :  { %s1628_s18 = scalar_lea.hbm %s1924_s3, 4096 }
  0x38   :  { %p1629_p10 = scmp.ne.s32.totalorder %s1924_s3, %s1628_s18  ;;  %p1632_p11 = scmp.lt.u32.totalorder %s1628_s18, %s1924_s3 }
  0x3a   :  { %p1634_p12 = pnand %p1632_p11, %p1629_p10 }
  0x3c   :  { %1637 = shalt.err (!%p1634_p12)
}
  0x3d   :  { %s1638_s0 = scalar_lea.vmem %s51_s20, 4096  ;;  %p1643_p0 = scmp.lt.s32.totalorder %s51_s20, %s51_s20 }
  0x3e   :  { %p1639_p13 = scmp.ne.s32.totalorder %s51_s20, %s1638_s0  ;;  %p1644_p1 = scmp.lt.s32.totalorder %s1638_s0, %s1638_s0 }
  0x40   :  { %p1645_p2 = por %p1644_p1, %p1643_p0 }
  0x42   :  { %p1646_p3 = pnand %p1645_p2, %p1639_p13 }
  0x44   :  { %1649 = shalt.err (!%p1646_p3)
}
  0x45   :  { %56 = dma.hbm_to_vmem [thread:$0]  %s1924_s3, 4096, %s51_s20, [#allocation6], %s1727_s27, %s1727_s27, %s1728_s28  }
  0x46   :  { %s1650_s16 = scalar_lea.hbm %s1928_s7, 4096 }
  0x47   :  { %p1651_p4 = scmp.ne.s32.totalorder %s1928_s7, %s1650_s16  ;;  %p1654_p5 = scmp.lt.u32.totalorder %s1650_s16, %s1928_s7 }
  0x49   :  { %p1656_p6 = pnand %p1654_p5, %p1651_p4 }
  0x4b   :  { %1659 = shalt.err (!%p1656_p6)
}
  0x4c   :  { %s1660_s21 = scalar_lea.vmem %s79_s22, 4096  ;;  %p1665_p8 = scmp.lt.s32.totalorder %s79_s22, %s79_s22 }
  0x4d   :  { %p1661_p7 = scmp.ne.s32.totalorder %s79_s22, %s1660_s21  ;;  %p1666_p9 = scmp.lt.s32.totalorder %s1660_s21, %s1660_s21 }
  0x4f   :  { %p1667_p10 = por %p1666_p9, %p1665_p8 }
  0x51   :  { %p1668_p11 = pnand %p1667_p10, %p1661_p7 }
  0x53   :  { %1671 = shalt.err (!%p1668_p11)
}
  0x54   :  { %84 = dma.hbm_to_vmem [thread:$0]  %s1928_s7, 4096, %s79_s22, [#allocation9], %s1727_s27, %s1727_s27, %s1728_s28  }
  0x55   :  { %s1733_s23 = smov [#allocation11]   ;;  %s1672_s25 = scalar_lea.hbm %s1930_s9, 2048 }
  0x56   :  { %s92_s1 = sshll.u32 %s1733_s23, 4  ;;  %p1673_p12 = scmp.ne.s32.totalorder %s1930_s9, %s1672_s25  ;;  %s93_s1 = int_to_ptr.vmem [resolvable:$true] %s92_s1 }
  0x57   :  { %p1676_p13 = scmp.lt.u32.totalorder %s1672_s25, %s1930_s9 }
  0x59   :  { %p1678_p0 = pnand %p1676_p13, %p1673_p12 }
  0x5b   :  { %1681 = shalt.err (!%p1678_p0)
}
  0x5c   :  { %s1682_s30 = scalar_lea.vmem %s93_s1, 2048  ;;  %p1687_p2 = scmp.lt.s32.totalorder %s93_s1, %s93_s1 }
  0x5d   :  { %p1683_p1 = scmp.ne.s32.totalorder %s93_s1, %s1682_s30  ;;  %p1688_p3 = scmp.lt.s32.totalorder %s1682_s30, %s1682_s30 }
  0x5f   :  { %p1689_p4 = por %p1688_p3, %p1687_p2 }
  0x61   :  { %p1690_p5 = pnand %p1689_p4, %p1683_p1 }
  0x63   :  { %1693 = shalt.err (!%p1690_p5)
}
  0x64   :  { %s1734_s7 = smov 64   ;;  %s1735_s27 = smov 4  }
  0x65   :  { %98 = dma.hbm_to_vmem [thread:$0]  %s1930_s9, 2048, %s93_s1, [#allocation12], %s1734_s7, %s1734_s7, %s1735_s27  }
  0x66   :  { %1716 = dma.done.wait [#allocation3], 64  }
  0x67   :  { %1717 = vsyncadd [#allocation3], 4294967232 }
  0x68   :  { %1718 = dma.done.wait [#allocation6], 6144  }
  0x69   :  { %1719 = vsyncadd [#allocation6], 4294961152 }
  0x6a   :  { %1720 = dma.done.wait [#allocation9], 8192  }
  0x6b   :  { %1721 = vsyncadd [#allocation9], 4294959104 }
  0x6c   :  { %1722 = dma.done.wait [#allocation12], 2048  }
  0x6d   :  { %1723 = vsyncadd [#allocation12], 4294965248  ;;  %v1736_v0 = vmov 0   ;;  %v1378_v1 = vld [vmem:[#allocation5 + $0x4] ss:$8 sps:$4 sm:$0xff]  }
  0x6e   :  { %261 = vmatprep.mubr.bf16.mxu0 %v1736_v0  ;;  %v1380_v2 = vld [vmem:[#allocation5] ss:$8 sps:$4 sm:$0xff]   ;;  %229 = vmatprep.subr.bf16.mxu0 %v1378_v1  ;;  %v1381_v3 = vld [vmem:[#allocation5 + $0x14] ss:$8 sps:$4 sm:$0xff]   ;;  %v1383_v4 = vld [vmem:[#allocation5 + $0x10] ss:$8 sps:$4 sm:$0xff]  }
  0x6f   :  { %230 = vmatpush1.bf16.msra.mxu0 %v1380_v2  ;;  %v1384_v5 = vld [vmem:[#allocation5 + $0x24] ss:$8 sps:$4 sm:$0xff]   ;;  %v1386_v6 = vld [vmem:[#allocation5 + $0x20] ss:$8 sps:$4 sm:$0xff]   ;;  %v1387_v7 = vld [vmem:[#allocation5 + $0x34] ss:$8 sps:$4 sm:$0xff]  }
  0x70   :  { %231 = vmatprep.subr.bf16.mxu0 %v1381_v3  ;;  %v1389_v8 = vld [vmem:[#allocation5 + $0x30] ss:$8 sps:$4 sm:$0xff]   ;;  %v1390_v9 = vld [vmem:[#allocation5 + $0x44] ss:$8 sps:$4 sm:$0xff]   ;;  %v1404_v11 = vld [vmem:[#allocation7] ss:$8 sps:$4 sm:$0xff]  }
  0x71   :  { %v1402_v10 = vld [vmem:[#allocation7 + $0x4] ss:$8 sps:$4 sm:$0xff]   ;;  %v1405_v12 = vld [vmem:[#allocation7 + $0x14] ss:$8 sps:$4 sm:$0xff]   ;;  %v1392_v13 = vld [vmem:[#allocation5 + $0x40] ss:$8 sps:$4 sm:$0xff]  }
  0x72   :  { %478 = vmatprep.subr.bf16.mxu1 %v1402_v10  ;;  %v1407_v14 = vld [vmem:[#allocation7 + $0x10] ss:$8 sps:$4 sm:$0xff]   ;;  %v1408_v15 = vld [vmem:[#allocation7 + $0x24] ss:$8 sps:$4 sm:$0xff]   ;;  %v1393_v16 = vld [vmem:[#allocation5 + $0x54] ss:$8 sps:$4 sm:$0xff]  }
  0x73   :  { %232 = vmatpush1.bf16.msra.mxu0 %v1383_v4  ;;  %479 = vmatpush1.bf16.msra.mxu1 %v1404_v11  ;;  %v1395_v17 = vld [vmem:[#allocation5 + $0x50] ss:$8 sps:$4 sm:$0xff]   ;;  %v1410_v18 = vld [vmem:[#allocation7 + $0x20] ss:$8 sps:$4 sm:$0xff]   ;;  %v1411_v19 = vld [vmem:[#allocation7 + $0x34] ss:$8 sps:$4 sm:$0xff]  }
  0x74   :  { %233 = vmatprep.subr.bf16.mxu0 %v1384_v5  ;;  %480 = vmatprep.subr.bf16.mxu1 %v1405_v12  ;;  %v1396_v20 = vld [vmem:[#allocation5 + $0x64] ss:$8 sps:$4 sm:$0xff]   ;;  %v1398_v21 = vld [vmem:[#allocation5 + $0x60] ss:$8 sps:$4 sm:$0xff]   ;;  %v1413_v22 = vld [vmem:[#allocation7 + $0x30] ss:$8 sps:$4 sm:$0xff]  }
  0x75   :  { %v1414_v23 = vld [vmem:[#allocation7 + $0x44] ss:$8 sps:$4 sm:$0xff]   ;;  %v1399_v24 = vld [vmem:[#allocation5 + $0x74] ss:$8 sps:$4 sm:$0xff]   ;;  %v1401_v25 = vld [vmem:[#allocation5 + $0x70] ss:$8 sps:$4 sm:$0xff]  }
  0x76   :  { %v1416_v26 = vld [vmem:[#allocation7 + $0x40] ss:$8 sps:$4 sm:$0xff]   ;;  %v1417_v27 = vld [vmem:[#allocation7 + $0x54] ss:$8 sps:$4 sm:$0xff]   ;;  %v1419_v29 = vld [vmem:[#allocation7 + $0x50] ss:$8 sps:$4 sm:$0xff]  }
  0x77   :  { %234 = vmatpush1.bf16.msra.mxu0 %v1386_v6  ;;  %481 = vmatpush1.bf16.msra.mxu1 %v1407_v14  ;;  %v120_v28 = vld [vmem:[#allocation2] sm:$0xf]  ;;  %v1420_v30 = vld [vmem:[#allocation7 + $0x64] ss:$8 sps:$4 sm:$0xff]   ;;  %v1422_v31 = vld [vmem:[#allocation7 + $0x60] ss:$8 sps:$4 sm:$0xff]   ;;  %v139_v14 = vlaneseq }
  0x78   :  { %235 = vmatprep.subr.bf16.mxu0 %v1387_v7  ;;  %482 = vmatprep.subr.bf16.mxu1 %v1408_v15  ;;  %v1423_v32 = vld [vmem:[#allocation7 + $0x74] ss:$8 sps:$4 sm:$0xff]   ;;  %v1425_v33 = vld [vmem:[#allocation7 + $0x70] ss:$8 sps:$4 sm:$0xff]   ;;  %v1426_v34 = vld [vmem:[#allocation7 + $0x84] ss:$8 sps:$4 sm:$0xff]  }
  0x79   :  { %v1428_v35 = vld [vmem:[#allocation7 + $0x80] ss:$8 sps:$4 sm:$0xff]   ;;  %v1429_v36 = vld [vmem:[#allocation7 + $0x94] ss:$8 sps:$4 sm:$0xff]   ;;  %v1431_v37 = vld [vmem:[#allocation7 + $0x90] ss:$8 sps:$4 sm:$0xff]  }
  0x7a   :  { %v1432_v38 = vld [vmem:[#allocation7 + $0xa4] ss:$8 sps:$4 sm:$0xff]   ;;  %v1434_v39 = vld [vmem:[#allocation7 + $0xa0] ss:$8 sps:$4 sm:$0xff]   ;;  %v1435_v40 = vld [vmem:[#allocation7 + $0xb4] ss:$8 sps:$4 sm:$0xff]  }
  0x7b   :  { %236 = vmatpush1.bf16.msra.mxu0 %v1389_v8  ;;  %483 = vmatpush1.bf16.msra.mxu1 %v1410_v18  ;;  %v1437_v41 = vld [vmem:[#allocation7 + $0xb0] ss:$8 sps:$4 sm:$0xff]   ;;  %v1438_v42 = vld [vmem:[#allocation7 + $0xc4] ss:$8 sps:$4 sm:$0xff]   ;;  %v1440_v43 = vld [vmem:[#allocation7 + $0xc0] ss:$8 sps:$4 sm:$0xff]  }
  0x7c   :  { %237 = vmatprep.subr.bf16.mxu0 %v1390_v9  ;;  %484 = vmatprep.subr.bf16.mxu1 %v1411_v19  ;;  %v1441_v44 = vld [vmem:[#allocation7 + $0xd4] ss:$8 sps:$4 sm:$0xff]   ;;  %v1443_v45 = vld [vmem:[#allocation7 + $0xd0] ss:$8 sps:$4 sm:$0xff]   ;;  %v1444_v46 = vld [vmem:[#allocation7 + $0xe4] ss:$8 sps:$4 sm:$0xff]  }
  0x7d   :  { %v1446_v47 = vld [vmem:[#allocation7 + $0xe0] ss:$8 sps:$4 sm:$0xff]   ;;  %v1447_v48 = vld [vmem:[#allocation7 + $0xf4] ss:$8 sps:$4 sm:$0xff]   ;;  %v1449_v49 = vld [vmem:[#allocation7 + $0xf0] ss:$8 sps:$4 sm:$0xff]  }
  0x7e   :  { %v1450_v50 = vld [vmem:[#allocation8] ss:$8 sps:$4 sm:$0xff]   ;;  %v1452_v51 = vld [vmem:[#allocation8 + $0x4] ss:$8 sps:$4 sm:$0xff]   ;;  %v1455_v52 = vld [vmem:[#allocation8 + $0x14] ss:$8 sps:$4 sm:$0xff]  }
  0x7f   :  { %238 = vmatpush1.bf16.msra.mxu0 %v1392_v13  ;;  %485 = vmatpush1.bf16.msra.mxu1 %v1413_v22  ;;  %v1453_v53 = vld [vmem:[#allocation8 + $0x10] ss:$8 sps:$4 sm:$0xff]   ;;  %v1458_v54 = vld [vmem:[#allocation8 + $0x24] ss:$8 sps:$4 sm:$0xff]   ;;  %v1456_v55 = vld [vmem:[#allocation8 + $0x20] ss:$8 sps:$4 sm:$0xff]  }
  0x80   :  { %239 = vmatprep.subr.bf16.mxu0 %v1393_v16  ;;  %486 = vmatprep.subr.bf16.mxu1 %v1414_v23  ;;  %v1461_v56 = vld [vmem:[#allocation8 + $0x34] ss:$8 sps:$4 sm:$0xff]   ;;  %v1459_v57 = vld [vmem:[#allocation8 + $0x30] ss:$8 sps:$4 sm:$0xff]   ;;  %v1464_v58 = vld [vmem:[#allocation8 + $0x44] ss:$8 sps:$4 sm:$0xff]  }
  0x81   :  { %v1462_v59 = vld [vmem:[#allocation8 + $0x40] ss:$8 sps:$4 sm:$0xff]   ;;  %v1467_v60 = vld [vmem:[#allocation8 + $0x54] ss:$8 sps:$4 sm:$0xff]   ;;  %v1465_v61 = vld [vmem:[#allocation8 + $0x50] ss:$8 sps:$4 sm:$0xff]  }
  0x82   :  { %v1470_v62 = vld [vmem:[#allocation8 + $0x64] ss:$8 sps:$4 sm:$0xff]   ;;  %v1468_v63 = vld [vmem:[#allocation8 + $0x60] ss:$8 sps:$4 sm:$0xff]   ;;  %v1473_v0 = vld [vmem:[#allocation8 + $0x74] ss:$8 sps:$4 sm:$0xff]  }
  0x83   :  { %240 = vmatpush1.bf16.msra.mxu0 %v1395_v17  ;;  %487 = vmatpush1.bf16.msra.mxu1 %v1416_v26  ;;  %v1471_v1 = vld [vmem:[#allocation8 + $0x70] ss:$8 sps:$4 sm:$0xff]   ;;  %v1476_v2 = vld [vmem:[#allocation8 + $0x84] ss:$8 sps:$4 sm:$0xff]   ;;  %v1474_v3 = vld [vmem:[#allocation8 + $0x80] ss:$8 sps:$4 sm:$0xff]  }
  0x84   :  { %241 = vmatprep.subr.bf16.mxu0 %v1396_v20  ;;  %488 = vmatprep.subr.bf16.mxu1 %v1417_v27  ;;  %v1479_v4 = vld [vmem:[#allocation8 + $0x94] ss:$8 sps:$4 sm:$0xff]   ;;  %v1477_v5 = vld [vmem:[#allocation8 + $0x90] ss:$8 sps:$4 sm:$0xff]   ;;  %v1482_v6 = vld [vmem:[#allocation8 + $0xa4] ss:$8 sps:$4 sm:$0xff]  }
  0x85   :  { %v1480_v7 = vld [vmem:[#allocation8 + $0xa0] ss:$8 sps:$4 sm:$0xff]   ;;  %v1485_v8 = vld [vmem:[#allocation8 + $0xb4] ss:$8 sps:$4 sm:$0xff]   ;;  %v1483_v9 = vld [vmem:[#allocation8 + $0xb0] ss:$8 sps:$4 sm:$0xff]  }
  0x86   :  { %v1488_v10 = vld [vmem:[#allocation8 + $0xc4] ss:$8 sps:$4 sm:$0xff]   ;;  %v1486_v11 = vld [vmem:[#allocation8 + $0xc0] ss:$8 sps:$4 sm:$0xff]   ;;  %v1491_v12 = vld [vmem:[#allocation8 + $0xd4] ss:$8 sps:$4 sm:$0xff]  }
  0x87   :  { %242 = vmatpush1.bf16.msra.mxu0 %v1398_v21  ;;  %489 = vmatpush1.bf16.msra.mxu1 %v1419_v29  ;;  %v1489_v13 = vld [vmem:[#allocation8 + $0xd0] ss:$8 sps:$4 sm:$0xff]   ;;  %v140_v15 = vshrl.u32 %v139_v14, 7  ;;  %v137_v17 = vld [vmem:[%s1923_s2] sm:$0x3] }
  0x88   :  { %243 = vmatprep.subr.bf16.mxu0 %v1399_v24  ;;  %490 = vmatprep.subr.bf16.mxu1 %v1420_v30  ;;  %v1545_v14 = vld [vmem:[#allocation10 + $0xf4] ss:$8 sps:$4 sm:$0xff]  }
  0x89   :  { %v1882_v16 = vsub.s32 0, %v140_v15  ;;  %v1887_v18 = vsub.s32 1, %v140_v15  ;;  %v1543_v15 = vld [vmem:[#allocation10 + $0xf0] ss:$8 sps:$4 sm:$0xff]  }
  0x8b   :  { %244 = vmatpush1.bf16.msra.mxu0 %v1401_v25  ;;  %491 = vmatpush1.bf16.msra.mxu1 %v1422_v31  ;;  %v142_v19 = vrot.slane %v137_v17, %v1882_v16  ;;  %v146_v20 = vrot.slane %v137_v17, %v1887_v18  ;;  %v1494_v31 = vld [vmem:[#allocation8 + $0xe4] ss:$8 sps:$4 sm:$0xff]  }
  0x8c   :  { %492 = vmatprep.subr.bf16.mxu1 %v1423_v32  ;;  %727 = vmatprep.subr.bf16.mxu0 %v1452_v51  ;;  %v1492_v32 = vld [vmem:[#allocation8 + $0xe0] ss:$8 sps:$4 sm:$0xff]   ;;  %v1524_v51 = vld [vmem:[#allocation10 + $0x84] ss:$8 sps:$4 sm:$0xff]  }
  0x8d   :  { %v1546_v17 = vld [vmem:[#allocation11 + $0x40] sm:$0xff]  }
  0x8e   :  { %262 = vmatmul.mubr.bf16.vlgmr.msra.gmra.mrb[0].mxu0 %v120_v28 }
  0x8f   :  { %493 = vmatpush1.bf16.msra.mxu1 %v1425_v33  ;;  %728 = vmatpush1.bf16.msra.mxu0 %v1450_v50  ;;  %v1497_v33 = vld [vmem:[#allocation8 + $0xf4] ss:$8 sps:$4 sm:$0xff]   ;;  %v1519_v50 = vld [vmem:[#allocation10 + $0x70] ss:$8 sps:$4 sm:$0xff]  }
  0x90   :  { %494 = vmatprep.subr.bf16.mxu1 %v1426_v34  ;;  %729 = vmatprep.subr.bf16.mxu0 %v1455_v52  ;;  %v1495_v34 = vld [vmem:[#allocation8 + $0xf0] ss:$8 sps:$4 sm:$0xff]   ;;  %v1522_v52 = vld [vmem:[#allocation10 + $0x80] ss:$8 sps:$4 sm:$0xff]  }
  0x93   :  { %495 = vmatpush1.bf16.msra.mxu1 %v1428_v35  ;;  %730 = vmatpush1.bf16.msra.mxu0 %v1453_v53  ;;  %v1498_v35 = vld [vmem:[#allocation10] ss:$8 sps:$4 sm:$0xff]   ;;  %v1527_v53 = vld [vmem:[#allocation10 + $0x94] ss:$8 sps:$4 sm:$0xff]  }
  0x94   :  { %496 = vmatprep.subr.bf16.mxu1 %v1429_v36  ;;  %731 = vmatprep.subr.bf16.mxu0 %v1458_v54  ;;  %v1500_v36 = vld [vmem:[#allocation10 + $0x4] ss:$8 sps:$4 sm:$0xff]   ;;  %v1525_v54 = vld [vmem:[#allocation10 + $0x90] ss:$8 sps:$4 sm:$0xff]  }
  0x97   :  { %497 = vmatpush1.bf16.msra.mxu1 %v1431_v37  ;;  %732 = vmatpush1.bf16.msra.mxu0 %v1456_v55  ;;  %v1503_v37 = vld [vmem:[#allocation10 + $0x14] ss:$8 sps:$4 sm:$0xff]   ;;  %v1530_v55 = vld [vmem:[#allocation10 + $0xa4] ss:$8 sps:$4 sm:$0xff]  }
  0x98   :  { %498 = vmatprep.subr.bf16.mxu1 %v1432_v38  ;;  %733 = vmatprep.subr.bf16.mxu0 %v1461_v56  ;;  %v1501_v38 = vld [vmem:[#allocation10 + $0x10] ss:$8 sps:$4 sm:$0xff]   ;;  %v1528_v56 = vld [vmem:[#allocation10 + $0xa0] ss:$8 sps:$4 sm:$0xff]  }
  0x9b   :  { %499 = vmatpush1.bf16.msra.mxu1 %v1434_v39  ;;  %734 = vmatpush1.bf16.msra.mxu0 %v1459_v57  ;;  %v1506_v39 = vld [vmem:[#allocation10 + $0x24] ss:$8 sps:$4 sm:$0xff]   ;;  %v1533_v57 = vld [vmem:[#allocation10 + $0xb4] ss:$8 sps:$4 sm:$0xff]  }
  0x9c   :  { %500 = vmatprep.subr.bf16.mxu1 %v1435_v40  ;;  %735 = vmatprep.subr.bf16.mxu0 %v1464_v58  ;;  %v1504_v40 = vld [vmem:[#allocation10 + $0x20] ss:$8 sps:$4 sm:$0xff]   ;;  %v1531_v58 = vld [vmem:[#allocation10 + $0xb0] ss:$8 sps:$4 sm:$0xff]  }
  0x9f   :  { %501 = vmatpush1.bf16.msra.mxu1 %v1437_v41  ;;  %736 = vmatpush1.bf16.msra.mxu0 %v1462_v59  ;;  %v1509_v41 = vld [vmem:[#allocation10 + $0x34] ss:$8 sps:$4 sm:$0xff]   ;;  %v1536_v59 = vld [vmem:[#allocation10 + $0xc4] ss:$8 sps:$4 sm:$0xff]  }
  0xa0   :  { %502 = vmatprep.subr.bf16.mxu1 %v1438_v42  ;;  %737 = vmatprep.subr.bf16.mxu0 %v1467_v60  ;;  %v1507_v42 = vld [vmem:[#allocation10 + $0x30] ss:$8 sps:$4 sm:$0xff]   ;;  %v1534_v60 = vld [vmem:[#allocation10 + $0xc0] ss:$8 sps:$4 sm:$0xff]  }
  0xa3   :  { %503 = vmatpush1.bf16.msra.mxu1 %v1440_v43  ;;  %738 = vmatpush1.bf16.msra.mxu0 %v1465_v61  ;;  %v1512_v43 = vld [vmem:[#allocation10 + $0x44] ss:$8 sps:$4 sm:$0xff]   ;;  %v1539_v61 = vld [vmem:[#allocation10 + $0xd4] ss:$8 sps:$4 sm:$0xff]  }
  0xa4   :  { %504 = vmatprep.subr.bf16.mxu1 %v1441_v44  ;;  %739 = vmatprep.subr.bf16.mxu0 %v1470_v62  ;;  %v1510_v44 = vld [vmem:[#allocation10 + $0x40] ss:$8 sps:$4 sm:$0xff]   ;;  %v1537_v62 = vld [vmem:[#allocation10 + $0xd0] ss:$8 sps:$4 sm:$0xff]  }
  0xa7   :  { %505 = vmatpush1.bf16.msra.mxu1 %v1443_v45  ;;  %740 = vmatpush1.bf16.msra.mxu0 %v1468_v63  ;;  %v1515_v45 = vld [vmem:[#allocation10 + $0x54] ss:$8 sps:$4 sm:$0xff]  }
  0xa8   :  { %506 = vmatprep.subr.bf16.mxu1 %v1444_v46  ;;  %741 = vmatprep.subr.bf16.mxu0 %v1473_v0  ;;  %v1513_v46 = vld [vmem:[#allocation10 + $0x50] ss:$8 sps:$4 sm:$0xff]   ;;  %v306_v63 = vld [vmem:[%s1925_s4] sm:$0x3] }
  0xa9   :  { %v311_v0 = vrot.slane %v306_v63, %v1882_v16 }
  0xab   :  { %507 = vmatpush1.bf16.msra.mxu1 %v1446_v47  ;;  %742 = vmatpush1.bf16.msra.mxu0 %v1471_v1  ;;  %v1518_v47 = vld [vmem:[#allocation10 + $0x64] ss:$8 sps:$4 sm:$0xff]   ;;  %v315_v1 = vrot.slane %v306_v63, %v1887_v18 }
  0xac   :  { %508 = vmatprep.subr.bf16.mxu1 %v1447_v48  ;;  %743 = vmatprep.subr.bf16.mxu0 %v1476_v2  ;;  %v1516_v48 = vld [vmem:[#allocation10 + $0x60] ss:$8 sps:$4 sm:$0xff]  }
  0xaf   :  { %509 = vmatpush1.bf16.msra.mxu1 %v1449_v49  ;;  %744 = vmatpush1.bf16.msra.mxu0 %v1474_v3  ;;  %v1521_v49 = vld [vmem:[#allocation10 + $0x74] ss:$8 sps:$4 sm:$0xff]  }
  0xb0   :  { %745 = vmatprep.subr.bf16.mxu0 %v1479_v4  ;;  %976 = vmatprep.subr.bf16.mxu1 %v1500_v36 }
  0xb3   :  { %746 = vmatpush1.bf16.msra.mxu0 %v1477_v5 }
  0xb4   :  { %747 = vmatprep.subr.bf16.mxu0 %v1482_v6 }
  0xb7   :  { %748 = vmatpush1.bf16.msra.mxu0 %v1480_v7 }
  0xb8   :  { %749 = vmatprep.subr.bf16.mxu0 %v1485_v8 }
  0xbb   :  { %750 = vmatpush1.bf16.msra.mxu0 %v1483_v9 }
  0xbc   :  { %751 = vmatprep.subr.bf16.mxu0 %v1488_v10 }
  0xbf   :  { %752 = vmatpush1.bf16.msra.mxu0 %v1486_v11 }
  0xc0   :  { %753 = vmatprep.subr.bf16.mxu0 %v1491_v12  ;;  %v1542_v12 = vld [vmem:[#allocation10 + $0xe4] ss:$8 sps:$4 sm:$0xff]  }
  0xc3   :  { %754 = vmatpush1.bf16.msra.mxu0 %v1489_v13  ;;  %v1540_v13 = vld [vmem:[#allocation10 + $0xe0] ss:$8 sps:$4 sm:$0xff]  }
  0xc4   :  { %755 = vmatprep.subr.bf16.mxu0 %v1494_v31 }
  0xc7   :  { %756 = vmatpush1.bf16.msra.mxu0 %v1492_v32 }
  0xc8   :  { %757 = vmatprep.subr.bf16.mxu0 %v1497_v33 }
  0xcb   :  { %758 = vmatpush1.bf16.msra.mxu0 %v1495_v34 }
  0xcc   :  { %1344 = vmatprep.subr.bf16.mxu0 %v1546_v17 }
 0x161   :  { %v263_v21 = vpop.f32.mrb[0].mxu0 }
 0x162   :  { %v264_v22 = vadd.f32 %v263_v21, %v142_v19  ;;  %v265_v23 = vpop.f32.mrb[1].mxu0  ;;  %v1547_v19 = vld [vmem:[#allocation11] sm:$0xff]   ;;  %v1549_v21 = vld [vmem:[#allocation11 + $0x8] sm:$0xff]  }
 0x163   :  { %v266_v24 = vadd.f32 %v265_v23, %v146_v20  ;;  %v267_v25 = vpop.f32.mrb[2].mxu0  ;;  %v1548_v20 = vld [vmem:[#allocation11 + $0x48] sm:$0xff]   ;;  %v1551_v23 = vld [vmem:[#allocation11 + $0x10] sm:$0xff]  }
 0x164   :  { %v270_v26 = vmax.f32 %v264_v22, 0.0  ;;  %v268_v27 = vpop.f32.mrb[3].mxu0  ;;  %v1550_v22 = vld [vmem:[#allocation11 + $0x50] sm:$0xff]   ;;  %v1553_v25 = vld [vmem:[#allocation11 + $0x18] sm:$0xff]  }
 0x165   :  { %v271_v28 = vmax.f32 %v266_v24, 0.0  ;;  %v1552_v24 = vld [vmem:[#allocation11 + $0x58] sm:$0xff]   ;;  %v1555_v27 = vld [vmem:[#allocation11 + $0x20] sm:$0xff]  }
 0x166   :  { %v272_v30 = vpack.c.bf16 %v270_v26, %v270_v26  ;;  %v1554_v26 = vld [vmem:[#allocation11 + $0x60] sm:$0xff]  }
 0x167   :  { %v273_v29 = vpack.c.bf16 %v271_v28, %v271_v28  ;;  %v1556_v28 = vld [vmem:[#allocation11 + $0x68] sm:$0xff]  }
 0x169   :  { %510 = vmatprep.mubr.bf16.mxu1 %v273_v29  ;;  %v1557_v29 = vld [vmem:[#allocation11 + $0x28] sm:$0xff]  }
 0x16a   :  { %511 = vmatmul.mubr.bf16.vlgmr.msra.gmra.mrb[0].mxu1 %v272_v30  ;;  %v555_v30 = vld [vmem:[%s1927_s6] sm:$0x3] }
 0x16b   :  { %977 = vmatpush1.bf16.msra.mxu1 %v1498_v35  ;;  %v560_v31 = vrot.slane %v555_v30, %v1882_v16  ;;  %v564_v32 = vrot.slane %v555_v30, %v1887_v18 }
 0x16c   :  { %978 = vmatprep.subr.bf16.mxu1 %v1503_v37 }
 0x16f   :  { %979 = vmatpush1.bf16.msra.mxu1 %v1501_v38 }
 0x170   :  { %980 = vmatprep.subr.bf16.mxu1 %v1506_v39 }
 0x173   :  { %981 = vmatpush1.bf16.msra.mxu1 %v1504_v40 }
 0x174   :  { %982 = vmatprep.subr.bf16.mxu1 %v1509_v41 }
 0x177   :  { %983 = vmatpush1.bf16.msra.mxu1 %v1507_v42 }
 0x178   :  { %984 = vmatprep.subr.bf16.mxu1 %v1512_v43  ;;  %v1558_v43 = vld [vmem:[#allocation11 + $0x70] sm:$0xff]  }
 0x17b   :  { %985 = vmatpush1.bf16.msra.mxu1 %v1510_v44  ;;  %v1559_v44 = vld [vmem:[#allocation11 + $0x30] sm:$0xff]  }
 0x17c   :  { %986 = vmatprep.subr.bf16.mxu1 %v1515_v45  ;;  %v1560_v45 = vld [vmem:[#allocation11 + $0x78] sm:$0xff]  }
 0x17f   :  { %987 = vmatpush1.bf16.msra.mxu1 %v1513_v46  ;;  %v1561_v46 = vld [vmem:[#allocation11 + $0x38] sm:$0xff]  }
 0x180   :  { %988 = vmatprep.subr.bf16.mxu1 %v1518_v47  ;;  %v804_v47 = vld [vmem:[%s1929_s8] sm:$0x3]  ;;  %s1737_s8 = smov [#allocation13]  }
 0x181   :  { %s1203_s19 = sshll.u32 %s1737_s8, 4  ;;  %s1204_s19 = int_to_ptr.vmem [resolvable:$true] %s1203_s19 }
 0x182   :  { %s1694_s21 = scalar_lea.vmem %s1204_s19, 128  ;;  %p1699_p7 = scmp.lt.s32.totalorder %s1204_s19, %s1204_s19 }
 0x183   :  { %989 = vmatpush1.bf16.msra.mxu1 %v1516_v48  ;;  %v809_v48 = vrot.slane %v804_v47, %v1882_v16  ;;  %p1695_p6 = scmp.ne.s32.totalorder %s1204_s19, %s1694_s21  ;;  %p1700_p8 = scmp.lt.s32.totalorder %s1694_s21, %s1694_s21 }
 0x184   :  { %990 = vmatprep.subr.bf16.mxu1 %v1521_v49  ;;  %v813_v49 = vrot.slane %v804_v47, %v1887_v18 }
 0x185   :  { %p1701_p9 = por %p1700_p8, %p1699_p7 }
 0x187   :  { %991 = vmatpush1.bf16.msra.mxu1 %v1519_v50  ;;  %p1702_p10 = pnand %p1701_p9, %p1695_p6 }
 0x188   :  { %992 = vmatprep.subr.bf16.mxu1 %v1524_v51 }
 0x18b   :  { %993 = vmatpush1.bf16.msra.mxu1 %v1522_v52 }
 0x18c   :  { %994 = vmatprep.subr.bf16.mxu1 %v1527_v53 }
 0x18f   :  { %995 = vmatpush1.bf16.msra.mxu1 %v1525_v54 }
 0x190   :  { %996 = vmatprep.subr.bf16.mxu1 %v1530_v55 }
 0x193   :  { %997 = vmatpush1.bf16.msra.mxu1 %v1528_v56 }
 0x194   :  { %998 = vmatprep.subr.bf16.mxu1 %v1533_v57 }
 0x197   :  { %999 = vmatpush1.bf16.msra.mxu1 %v1531_v58 }
 0x198   :  { %1000 = vmatprep.subr.bf16.mxu1 %v1536_v59 }
 0x19b   :  { %1001 = vmatpush1.bf16.msra.mxu1 %v1534_v60 }
 0x19c   :  { %1002 = vmatprep.subr.bf16.mxu1 %v1539_v61  ;;  %v1327_v61 = vld [vmem:[%s1931_s10] ss:$0 sm:$0xff] }
 0x19f   :  { %1003 = vmatpush1.bf16.msra.mxu1 %v1537_v62 }
 0x1a0   :  { %1004 = vmatprep.subr.bf16.mxu1 %v1542_v12 }
 0x1a3   :  { %1005 = vmatpush1.bf16.msra.mxu1 %v1540_v13 }
 0x1a4   :  { %1006 = vmatprep.subr.bf16.mxu1 %v1545_v14 }
 0x1a7   :  { %1007 = vmatpush1.bf16.msra.mxu1 %v1543_v15 }
 0x23d   :  { %v512_v2 = vpop.f32.mrb[0].mxu1 }
 0x23e   :  { %v513_v3 = vadd.f32 %v512_v2, %v311_v0  ;;  %v514_v4 = vpop.f32.mrb[1].mxu1 }
 0x23f   :  { %v515_v5 = vadd.f32 %v514_v4, %v315_v1  ;;  %v516_v6 = vpop.f32.mrb[2].mxu1 }
 0x240   :  { %v519_v7 = vmax.f32 %v513_v3, 0.0  ;;  %v517_v8 = vpop.f32.mrb[3].mxu1 }
 0x241   :  { %v520_v9 = vmax.f32 %v515_v5, 0.0 }
 0x242   :  { %v521_v11 = vpack.c.bf16 %v519_v7, %v519_v7 }
 0x243   :  { %v522_v10 = vpack.c.bf16 %v520_v9, %v520_v9 }
 0x245   :  { %759 = vmatprep.mubr.bf16.mxu0 %v522_v10 }
 0x246   :  { %760 = vmatmul.mubr.bf16.vlgmr.msra.gmra.mrb[4].mxu0 %v521_v11 }
 0x247   :  { %1345 = vmatpush3.bf16.msra.mxu0 %v1547_v19 }
 0x248   :  { %1346 = vmatprep.subr.bf16.mxu0 %v1548_v20 }
 0x24b   :  { %1347 = vmatpush3.bf16.msra.mxu0 %v1549_v21 }
 0x24c   :  { %1348 = vmatprep.subr.bf16.mxu0 %v1550_v22 }
 0x24f   :  { %1349 = vmatpush3.bf16.msra.mxu0 %v1551_v23 }
 0x250   :  { %1350 = vmatprep.subr.bf16.mxu0 %v1552_v24 }
 0x253   :  { %1351 = vmatpush3.bf16.msra.mxu0 %v1553_v25 }
 0x254   :  { %1352 = vmatprep.subr.bf16.mxu0 %v1554_v26 }
 0x257   :  { %1353 = vmatpush3.bf16.msra.mxu0 %v1555_v27 }
 0x258   :  { %1354 = vmatprep.subr.bf16.mxu0 %v1556_v28 }
 0x25b   :  { %1355 = vmatpush3.bf16.msra.mxu0 %v1557_v29 }
 0x25c   :  { %1356 = vmatprep.subr.bf16.mxu0 %v1558_v43 }
 0x25f   :  { %1357 = vmatpush3.bf16.msra.mxu0 %v1559_v44 }
 0x260   :  { %1358 = vmatprep.subr.bf16.mxu0 %v1560_v45 }
 0x263   :  { %1359 = vmatpush3.bf16.msra.mxu0 %v1561_v46 }
 0x319   :  { %v761_v33 = vpop.f32.mrb[4].mxu0 }
 0x31a   :  { %v762_v34 = vadd.f32 %v761_v33, %v560_v31  ;;  %v763_v35 = vpop.f32.mrb[5].mxu0 }
 0x31b   :  { %v764_v36 = vadd.f32 %v763_v35, %v564_v32  ;;  %v765_v37 = vpop.f32.mrb[6].mxu0 }
 0x31c   :  { %v768_v38 = vmax.f32 %v762_v34, 0.0  ;;  %v766_v39 = vpop.f32.mrb[7].mxu0 }
 0x31d   :  { %v769_v40 = vmax.f32 %v764_v36, 0.0 }
 0x31e   :  { %v770_v42 = vpack.c.bf16 %v768_v38, %v768_v38 }
 0x31f   :  { %v771_v41 = vpack.c.bf16 %v769_v40, %v769_v40 }
 0x321   :  { %1008 = vmatprep.mubr.bf16.mxu1 %v771_v41 }
 0x322   :  { %1009 = vmatmul.mubr.bf16.vlgmr.msra.gmra.mrb[4].mxu1 %v770_v42 }
 0x3f5   :  { %v1010_v50 = vpop.f32.mrb[4].mxu1 }
 0x3f6   :  { %v1011_v51 = vadd.f32 %v1010_v50, %v809_v48  ;;  %v1012_v52 = vpop.f32.mrb[5].mxu1 }
 0x3f7   :  { %v1013_v53 = vadd.f32 %v1012_v52, %v813_v49  ;;  %v1014_v54 = vpop.f32.mrb[6].mxu1 }
 0x3f8   :  { %v1017_v55 = vmax.f32 %v1011_v51, 0.0  ;;  %v1015_v56 = vpop.f32.mrb[7].mxu1 }
 0x3f9   :  { %v1018_v57 = vmax.f32 %v1013_v53, 0.0 }
 0x3fa   :  { %v1019_v59 = vpack.c.bf16 %v1017_v55, %v1017_v55 }
 0x3fb   :  { %v1020_v58 = vpack.c.bf16 %v1018_v57, %v1018_v57 }
 0x3fd   :  { %1188 = vmatprep.mubr.bf16.mxu0 %v1020_v58 }
 0x3fe   :  { %1189 = vmatmul.mubr.bf16.vlgmr.msra.gmra.mrb[8].mxu0 %v1019_v59 }
 0x4d1   :  { %v1360_v60 = vpop.f32.mrb[8].mxu0 }
 0x4d2   :  { %v1361_v16 = vpop.f32.mrb[9].mxu0 }
 0x4d3   :  { %v1362_v18 = vadd.f32 %v1361_v16, %v1360_v60  ;;  %v1363_v62 = vpop.f32.mrb[10].mxu0 }
 0x4d4   :  { %v1364_v63 = vpop.f32.mrb[11].mxu0 }
 0x4d5   :  { %v1191_v0 = vadd.f32 %v1362_v18, %v1327_v61 }
 0x4d7   :  { %1196 = vst [vmem:[#allocation13] sm:$0xff] %v1191_v0 }
 0x4d8   :  { %1705 = shalt.err (!%p1702_p10)
}
 0x4d9   :  { %s1706_s10 = scalar_lea.hbm %s1932_s11, 128 }
 0x4da   :  { %p1707_p11 = scmp.ne.s32.totalorder %s1932_s11, %s1706_s10  ;;  %p1710_p12 = scmp.lt.u32.totalorder %s1706_s10, %s1932_s11 }
 0x4dc   :  { %p1712_p13 = pnand %p1710_p12, %p1707_p11 }
 0x4de   :  { %1715 = shalt.err (!%p1712_p13)
}
 0x4df   :  { %1206 = dma.vmem_to_hbm [thread:$0]  %s1204_s19, 128, %s1932_s11, [#allocation4]  }
 0x4e0   :  { %1724 = dma.done.wait [#allocation4], 128  }
 0x4e1   :  { %1725 = vsyncadd [#allocation4], 4294967168 }
 0x4e2   :  { %1210 = vsyncpa [#allocation3], 1 }
 0x4e3   :  { %1211 = vsyncpa [#allocation6], 1 }
 0x4e4   :  { %1212 = vsyncpa [#allocation9], 1 }
 0x4e5   :  { %1213 = vsyncpa [#allocation12], 1 }
 0x4e6   :  { %1214 = vsyncpa [#allocation4], 1 }

</bundles_post_ra>
